<compile_context>
chip_gen: v5e
topology: v5e:2x2
jax: 0.10.0
libtpu: 0.0.40
codegen_flags: <defaults>
</compile_context>

<pallas_src>
import jax
import jax.numpy as jnp
from jax import lax
from jax.experimental import pallas as pl
from jax.experimental.pallas import tpu as pltpu

LANE = 128
SUBLANE = 8

# EUP vrcp for the sigmoid denominator (perf-review suggestion).  Relative
# error <= ~1e-3 on the gate output; set False to validate at 1e-5.
_APPROX_GATE_RECIP = True


# ----------------------------------------------------------------------------
# VMEM budget / tile-size selection
# ----------------------------------------------------------------------------
def _vmem_config():
    """(vmem_limit_bytes, double-buffered footprint budget) per generation."""
    phys = None
    try:
        phys = getattr(pltpu.get_tpu_info(), "vmem_capacity_bytes", None)
    except Exception:
        phys = None
    if not phys:
        phys = 64 << 20                       # conservative (v7x-sized) fallback
    limit = int(min((phys * 3) // 4, 96 << 20))
    # total double-buffered block footprint target (leave headroom under limit)
    foot = min(limit - (4 << 20), (28 << 20) if phys <= (64 << 20) else (48 << 20))
    foot = int(max(foot, 8 << 20))
    return limit, foot


def _largest_divisor_leq(n, m):
    m = max(1, min(m, n))
    best, d = 1, 1
    while d * d <= n:
        if n % d == 0:
            if d <= m and d > best:
                best = d
            q = n // d
            if q <= m and q > best:
                best = q
        d += 1
    return best


def _divisor_tile(Q, cap):
    """Largest multiple-of-8 divisor of Q that is <= cap (0 if none)."""
    best, d = 0, SUBLANE
    while d <= cap:
        if Q % d == 0:
            best = d
        d += SUBLANE
    return best


def _pick_tile(Q, cap, want_splits):
    """Largest legal rows-of-128 tile (<= cap).  Legal = Q itself or a
    multiple-of-8 divisor of Q.  Prefers >= want_splits grid steps when a
    legal split exists (v7x megacore).  Returns 0 if nothing fits."""
    cap = max(int(cap), 1)
    if want_splits > 1 and Q >= want_splits * SUBLANE:
        t = _divisor_tile(Q, min(cap, Q // want_splits))
        if t:
            return t
    if Q <= cap:
        return Q
    return _divisor_tile(Q, cap)


def _conv_config(N, C, Q, itemsize, foot_bytes):
    """Pick (channel block TC, pixel tile TQ) for pass 1.

    Budget: 2 * (TC*TQ*128*itemsize + TQ*128*4) <= foot_bytes (double buffers).
    TQ == 0 means Q admits no legal tile under the budget (caller pads Q to a
    multiple of 8 and retries -- an 8-row tile is then always legal).
    """
    row_cap = 2048

    def max_rows(tc):
        return foot_bytes // (2 * LANE * (tc * itemsize + 4))

    TC = C
    if max_rows(TC) < SUBLANE and C > 1:
        # Channel blocking for very large C: largest divisor of C that still
        # allows an 8-row pixel tile inside the budget.
        tc_budget = max((foot_bytes // (2 * LANE * SUBLANE) - 4) // itemsize, 1)
        TC = _largest_divisor_leq(C, tc_budget)
    cap = min(max_rows(TC), row_cap)
    want = 2 if N == 1 else 1
    return TC, _pick_tile(Q, cap, want)


def _gate_tile(rows, foot_bytes, out_itemsize):
    """Rows-of-128 tile for the elementwise gate pass (cdiv grid; the last
    partial block's out-of-range rows are masked by Pallas)."""
    if rows <= SUBLANE:
        return rows
    cap = foot_bytes // (2 * LANE * (4 + out_itemsize))
    cap = max(SUBLANE, min(cap, 4096))
    if rows >= 2 * SUBLANE:
        # keep >= 2 grid steps so both v7x TensorCores get work
        half = (-(-rows // 2) + SUBLANE - 1) // SUBLANE * SUBLANE
        cap = min(cap, max(half, SUBLANE))
    cap = (cap // SUBLANE) * SUBLANE
    return max(SUBLANE, min(cap, (rows // SUBLANE) * SUBLANE))


def _row_chunk(TQ, itemsize):
    """Dtype-aware row chunk: one packed vreg worth of sublanes."""
    base = SUBLANE * max(1, 4 // max(itemsize, 1))   # 8 f32 / 16 bf16 / 32 int8
    return min(base, TQ)


# ----------------------------------------------------------------------------
# Pass 1: 1x1 conv (C -> 1) with fused BN partial statistics
# ----------------------------------------------------------------------------
def _make_conv_kernel(TC, TQ, RC, multi_cb):
    n_full = TQ // RC
    tail = TQ - n_full * RC
    n_s = TQ // SUBLANE
    s_tail = TQ - n_s * SUBLANE
    unroll_ch = TC <= 32

    def kernel(w_ref, x_ref, y_ref, s_ref):
        # w_ref: [C]            f32 SMEM  (1x1 conv weights; bias dropped --
        #                                  it cancels under training-mode BN)
        # x_ref: [TC, TQ, 128]  x-dtype VMEM
        # y_ref: [TQ, 128]      f32 VMEM  (conv output; resident across cb)
        # s_ref: [2, 128]       f32 VMEM  (partial sum / sum-of-squares of y)
        if multi_cb:
            cb = pl.program_id(2)
            c0 = cb * TC
            is_last = cb == pl.num_programs(2) - 1
        else:
            cb = None
            c0 = 0

        def conv_rows(r, rc):
            if unroll_ch:
                acc = x_ref[0, pl.ds(r, rc), :].astype(jnp.float32) * w_ref[c0]
                for c in range(1, TC):
                    acc = acc + (x_ref[c, pl.ds(r, rc), :].astype(jnp.float32)
                                 * w_ref[c0 + c])
            else:
                def ch_body(c, a):
                    return a + (x_ref[c, pl.ds(r, rc), :].astype(jnp.float32)
                                * w_ref[c0 + c])
                acc = lax.fori_loop(0, TC, ch_body,
                                    jnp.zeros((rc, LANE), jnp.float32), unroll=4)
            if multi_cb:
                @pl.when(cb == 0)
                def _():
                    y_ref[pl.ds(r, rc), :] = acc

                @pl.when(cb != 0)
                def _():
                    y_ref[pl.ds(r, rc), :] = y_ref[pl.ds(r, rc), :] + acc
            else:
                y_ref[pl.ds(r, rc), :] = acc

        if n_full > 0:
            def row_body(i, carry):
                conv_rows(pl.multiple_of(i * RC, RC), RC)
                return carry
            lax.fori_loop(0, n_full, row_body, 0, unroll=min(2, n_full))
        if tail:
            conv_rows(n_full * RC, tail)

        def finalize():
            # Lane-dense partial sums of the completed y tile (XLU sublane
            # reduces; free under the HBM-bound DMA).
            def add_stats(carry, r, rc):
                s, ss = carry
                v = y_ref[pl.ds(r, rc), :]
                return (s + jnp.sum(v, axis=0, keepdims=True),
                        ss + jnp.sum(v * v, axis=0, keepdims=True))

            zero = jnp.zeros((1, LANE), jnp.float32)
            carry = (zero, zero)
            if n_s > 0:
                def s_body(i, c):
                    return add_stats(c, pl.multiple_of(i * SUBLANE, SUBLANE), SUBLANE)
                carry = lax.fori_loop(0, n_s, s_body, carry, unroll=min(2, n_s))
            if s_tail:
                carry = add_stats(carry, n_s * SUBLANE, s_tail)
            s_ref[...] = jnp.concatenate([carry[0], carry[1]], axis=0)

        if multi_cb:
            @pl.when(is_last)
            def _():
                finalize()
        else:
            finalize()

    return kernel


def _conv_pass(x4, w, N, C, Q, TQ, TC, vmem_limit):
    itemsize = x4.dtype.itemsize
    RC = _row_chunk(TQ, itemsize)
    multi_cb = TC != C
    Qt = Q // TQ
    kernel = _make_conv_kernel(TC, TQ, RC, multi_cb)
    out_shape = (jax.ShapeDtypeStruct((N, Q, LANE), jnp.float32),
                 jax.ShapeDtypeStruct((N, Qt, 2, LANE), jnp.float32))
    if multi_cb:
        grid = (N, Qt, C // TC)
        x_spec = pl.BlockSpec((None, TC, TQ, LANE), lambda n, t, cb: (n, cb, t, 0))
        y_spec = pl.BlockSpec((None, TQ, LANE), lambda n, t, cb: (n, t, 0))
        s_spec = pl.BlockSpec((None, None, 2, LANE), lambda n, t, cb: (n, t, 0, 0))
        sem = ("parallel", "parallel", "arbitrary")
    else:
        grid = (N, Qt)
        x_spec = pl.BlockSpec((None, C, TQ, LANE), lambda n, t: (n, 0, t, 0))
        y_spec = pl.BlockSpec((None, TQ, LANE), lambda n, t: (n, t, 0))
        s_spec = pl.BlockSpec((None, None, 2, LANE), lambda n, t: (n, t, 0, 0))
        sem = ("parallel", "parallel")
    return pl.pallas_call(
        kernel,
        out_shape=out_shape,
        grid=grid,
        in_specs=[pl.BlockSpec(memory_space=pltpu.MemorySpace.SMEM), x_spec],
        out_specs=[y_spec, s_spec],
        compiler_params=pltpu.CompilerParams(
            dimension_semantics=sem, vmem_limit_bytes=vmem_limit),
    )(w, x4)


# ----------------------------------------------------------------------------
# Pass 2: folded BN affine + sigmoid gate
# ----------------------------------------------------------------------------
def _gate_kernel(ab_ref, y_ref, o_ref):
    # ab_ref: [2]        f32 SMEM  (a = gamma*rsqrt(var+eps), b = beta - a*mean)
    # y_ref : [TR, 128]  f32 VMEM
    # o_ref : [TR, 128]  out-dtype VMEM
    z = y_ref[...] * ab_ref[0] + ab_ref[1]
    denom = 1.0 + jnp.exp(-z)                              # EUP exp
    o_ref[...] = pl.reciprocal(denom, approx=_APPROX_GATE_RECIP).astype(o_ref.dtype)


# ----------------------------------------------------------------------------
# Wrapper
# ----------------------------------------------------------------------------
def sse_forward(x_nchw, conv_w, conv_b, bn_gamma, bn_beta, bn_eps=1e-5):
    """x_nchw: [N, C, H, W] (f32 or bf16). Returns [N, 1, H, W] in x's dtype."""
    del conv_b  # conv bias cancels exactly under training-mode BatchNorm
    N, C, H, W = x_nchw.shape
    P = H * W
    itemsize = x_nchw.dtype.itemsize
    vmem_limit, foot = _vmem_config()

    Q = pl.cdiv(P, LANE)
    TC, TQ = _conv_config(N, C, Q, itemsize, foot)
    if TQ == 0:
        # No legal tile divides Q under the VMEM budget: pad Q up to a
        # multiple of 8 so an 8-row tile always exists.
        Q = ((Q + SUBLANE - 1) // SUBLANE) * SUBLANE
        TC, TQ = _conv_config(N, C, Q, itemsize, foot)
    assert TQ > 0
    Ppad = Q * LANE

    x3 = x_nchw.reshape(N, C, P)                           # free reshape
    if Ppad != P:
        # TODO(synk): this pad is a full HBM copy of x; a masked-last-tile
        # conv kernel would avoid it when H*W is not a multiple of 128 (zero
        # rows are already harmless to the fused statistics).
        x3 = jnp.pad(x3, ((0, 0), (0, 0), (0, Ppad - P)))
    x4 = x3.reshape(N, C, Q, LANE)                         # free reshape
    w = conv_w.reshape(C).astype(jnp.float32)              # (1,C,1,1) -> [C]

    # ---- Pass 1: conv + fused BN partial sums ----
    y, stats = _conv_pass(x4, w, N, C, Q, TQ, TC, vmem_limit)

    # ---- Finalize BN batch statistics (one pass; padded lanes contribute 0) ----
    tot = jnp.sum(stats, axis=(0, 1, 3))                   # [2]: sum, sum of squares
    count = jnp.float32(N * P)
    mean = tot[0] / count
    # TODO(synk): E[y^2]-mean^2 can lose precision if |mean| >> std of the conv output.
    var = jnp.maximum(tot[1] / count - mean * mean, 0.0)
    a = bn_gamma * lax.rsqrt(var + bn_eps)
    b = bn_beta - a * mean
    ab = jnp.stack([a, b]).astype(jnp.float32)

    # ---- Pass 2: sigmoid(a*y + b) over dense (TR, 128) tiles ----
    rows = N * Q
    TR = _gate_tile(rows, foot, itemsize)
    out2 = pl.pallas_call(
        _gate_kernel,
        out_shape=jax.ShapeDtypeStruct((rows, LANE), x_nchw.dtype),
        grid=(pl.cdiv(rows, TR),),
        in_specs=[pl.BlockSpec(memory_space=pltpu.MemorySpace.SMEM),  # [2] scalars
                  pl.BlockSpec((TR, LANE), lambda t: (t, 0))],
        out_specs=pl.BlockSpec((TR, LANE), lambda t: (t, 0)),
        compiler_params=pltpu.CompilerParams(
            dimension_semantics=("parallel",), vmem_limit_bytes=vmem_limit),
    )(ab, y.reshape(rows, LANE))

    out = out2.reshape(N, Ppad)
    if Ppad != P:
        out = out[:, :P]
    return out.reshape(N, H, W)[:, None, :, :]


# ----------------------------------------------------------------------------
# Pure-JAX reference (matches PyTorch forward semantics, incl. conv bias)
# ----------------------------------------------------------------------------
def sse_reference(x_nchw, conv_w, conv_b, bn_gamma, bn_beta, bn_eps=1e-5):
    N, C, H, W = x_nchw.shape
    w = conv_w.reshape(1, C).astype(jnp.float32)
    y = jnp.einsum("nchw,oc->nohw", x_nchw.astype(jnp.float32), w) + conv_b
    mean = jnp.mean(y)
    var = jnp.mean((y - mean) ** 2)
    y_hat = (y - mean) * lax.rsqrt(var + bn_eps)
    z = bn_gamma * y_hat + bn_beta
    return jax.nn.sigmoid(z)


if __name__ == "__main__":
    key = jax.random.PRNGKey(0)
    kx, kw, kb = jax.random.split(key, 3)

    N, C, H, W = 2, 4, 16, 16
    x = jax.random.normal(kx, (N, C, H, W), dtype=jnp.float32)

    # PyTorch-like uniform(-1/sqrt(C), 1/sqrt(C)) conv init; BN gamma=1, beta=0.
    bound = 1.0 / jnp.sqrt(jnp.float32(C))
    conv_w = jax.random.uniform(kw, (1, C, 1, 1), jnp.float32, -bound, bound)
    conv_b = jax.random.uniform(kb, (), jnp.float32, -bound, bound)
    bn_gamma = jnp.float32(1.0)
    bn_beta = jnp.float32(0.0)

    fwd = jax.jit(sse_forward)
    out = jax.block_until_ready(fwd(x, conv_w, conv_b, bn_gamma, bn_beta))

    ref = sse_reference(x, conv_w, conv_b, bn_gamma, bn_beta)
    assert out.shape == (N, 1, H, W), out.shape
    # Tolerance accounts for the EUP approximate reciprocal in the gate
    # (<= ~1e-3 on a [0,1] sigmoid); set _APPROX_GATE_RECIP=False for 1e-5.
    tol = 2e-3 if _APPROX_GATE_RECIP else 1e-5
    assert jnp.allclose(out, ref, rtol=tol, atol=tol), (
        float(jnp.max(jnp.abs(out - ref)))
    )

    print("KERNEL_OK")
</pallas_src>

<mosaic_0001>
module attributes {stable_mosaic.version = 11 : i64} {
  func.func @kernel(%arg0: i32, %arg1: i32, %arg2: memref<4xf32, #tpu.memory_space<smem>>, %arg3: memref<1x4x2x128xf32, #tpu.memory_space<vmem>>, %arg4: memref<1x2x128xf32, #tpu.memory_space<vmem>>, %arg5: memref<1x1x2x128xf32, #tpu.memory_space<vmem>>) attributes {dimension_semantics = [#tpu.dimension_semantics<parallel>, #tpu.dimension_semantics<parallel>], iteration_bounds = array<i64: 2, 1>, scalar_prefetch = 0 : i64, scratch_operands = 0 : i64, tpu.core_type = #tpu.core_type<tc>, window_params = [{transform_indices = @transform_0, window_bounds = array<i64: 4>}, {transform_indices = @transform_1, window_bounds = array<i64: 1, 4, 2, 128>}, {transform_indices = @transform_2, window_bounds = array<i64: 1, 2, 128>}, {transform_indices = @transform_3, window_bounds = array<i64: 1, 1, 2, 128>}]} {
    %c0_i32 = arith.constant 0 : i32
    %c2_i32 = arith.constant 2 : i32
    %0 = arith.muli %c0_i32, %c2_i32 : i32
    %1 = tpu.assume_multiple %0, 2 : i32
    %c0 = arith.constant 0 : index
    %c0_0 = arith.constant 0 : index
    %2 = arith.index_cast %1 : i32 to index
    %c0_1 = arith.constant 0 : index
    %3 = vector.load %arg3[%c0, %c0_0, %2, %c0_1] : memref<1x4x2x128xf32, #tpu.memory_space<vmem>>, vector<1x1x2x128xf32>
    %4 = vector.shape_cast %3 : vector<1x1x2x128xf32> to vector<2x128xf32>
    %c0_2 = arith.constant 0 : index
    %5 = memref.load %arg2[%c0_2] : memref<4xf32, #tpu.memory_space<smem>>
    %6 = vector.broadcast %5 : f32 to vector<2x128xf32>
    %7 = arith.mulf %4, %6 : vector<2x128xf32>
    %c0_3 = arith.constant 0 : index
    %c1 = arith.constant 1 : index
    %8 = arith.index_cast %1 : i32 to index
    %c0_4 = arith.constant 0 : index
    %9 = vector.load %arg3[%c0_3, %c1, %8, %c0_4] : memref<1x4x2x128xf32, #tpu.memory_space<vmem>>, vector<1x1x2x128xf32>
    %10 = vector.shape_cast %9 : vector<1x1x2x128xf32> to vector<2x128xf32>
    %c1_5 = arith.constant 1 : index
    %11 = memref.load %arg2[%c1_5] : memref<4xf32, #tpu.memory_space<smem>>
    %12 = vector.broadcast %11 : f32 to vector<2x128xf32>
    %13 = arith.mulf %10, %12 : vector<2x128xf32>
    %14 = arith.addf %7, %13 : vector<2x128xf32>
    %c0_6 = arith.constant 0 : index
    %c2 = arith.constant 2 : index
    %15 = arith.index_cast %1 : i32 to index
    %c0_7 = arith.constant 0 : index
    %16 = vector.load %arg3[%c0_6, %c2, %15, %c0_7] : memref<1x4x2x128xf32, #tpu.memory_space<vmem>>, vector<1x1x2x128xf32>
    %17 = vector.shape_cast %16 : vector<1x1x2x128xf32> to vector<2x128xf32>
    %c2_8 = arith.constant 2 : index
    %18 = memref.load %arg2[%c2_8] : memref<4xf32, #tpu.memory_space<smem>>
    %19 = vector.broadcast %18 : f32 to vector<2x128xf32>
    %20 = arith.mulf %17, %19 : vector<2x128xf32>
    %21 = arith.addf %14, %20 : vector<2x128xf32>
    %c0_9 = arith.constant 0 : index
    %c3 = arith.constant 3 : index
    %22 = arith.index_cast %1 : i32 to index
    %c0_10 = arith.constant 0 : index
    %23 = vector.load %arg3[%c0_9, %c3, %22, %c0_10] : memref<1x4x2x128xf32, #tpu.memory_space<vmem>>, vector<1x1x2x128xf32>
    %24 = vector.shape_cast %23 : vector<1x1x2x128xf32> to vector<2x128xf32>
    %c3_11 = arith.constant 3 : index
    %25 = memref.load %arg2[%c3_11] : memref<4xf32, #tpu.memory_space<smem>>
    %26 = vector.broadcast %25 : f32 to vector<2x128xf32>
    %27 = arith.mulf %24, %26 : vector<2x128xf32>
    %28 = arith.addf %21, %27 : vector<2x128xf32>
    %c0_12 = arith.constant 0 : index
    %29 = arith.index_cast %1 : i32 to index
    %c0_13 = arith.constant 0 : index
    %30 = vector.load %arg4[%c0_12, %29, %c0_13] : memref<1x2x128xf32, #tpu.memory_space<vmem>>, vector<1x2x128xf32>
    %31 = vector.shape_cast %30 : vector<1x2x128xf32> to vector<2x128xf32>
    %32 = vector.shape_cast %28 : vector<2x128xf32> to vector<1x2x128xf32>
    tpu.vector_store %arg4[%c0_12, %29, %c0_13], %32 {strides = array<i32>} : memref<1x2x128xf32, #tpu.memory_space<vmem>>, vector<1x2x128xf32>,
    %c1_i32 = arith.constant 1 : i32
    %cst = arith.constant 0.000000e+00 : f32
    %33 = vector.broadcast %cst : f32 to vector<1x128xf32>
    %c0_14 = arith.constant 0 : index
    %c0_15 = arith.constant 0 : index
    %c0_16 = arith.constant 0 : index
    %34 = vector.load %arg4[%c0_14, %c0_15, %c0_16] : memref<1x2x128xf32, #tpu.memory_space<vmem>>, vector<1x2x128xf32>
    %35 = vector.shape_cast %34 : vector<1x2x128xf32> to vector<2x128xf32>
    %cst_17 = arith.constant dense<0.000000e+00> : vector<128xf32>
    %36 = vector.multi_reduction <add>, %35, %cst_17 [0] : vector<2x128xf32> to vector<128xf32>
    %37 = vector.shape_cast %36 : vector<128xf32> to vector<1x128xf32>
    %38 = arith.addf %33, %37 : vector<1x128xf32>
    %39 = arith.mulf %35, %35 : vector<2x128xf32>
    %cst_18 = arith.constant dense<0.000000e+00> : vector<128xf32>
    %40 = vector.multi_reduction <add>, %39, %cst_18 [0] : vector<2x128xf32> to vector<128xf32>
    %41 = vector.shape_cast %40 : vector<128xf32> to vector<1x128xf32>
    %42 = arith.addf %33, %41 : vector<1x128xf32>
    %43 = tpu.concatenate %38, %42 in 0 : vector<1x128xf32>, vector<1x128xf32> -> vector<2x128xf32>
    %c0_19 = arith.constant 0 : index
    %c0_20 = arith.constant 0 : index
    %c0_21 = arith.constant 0 : index
    %c0_22 = arith.constant 0 : index
    %44 = vector.load %arg5[%c0_19, %c0_20, %c0_21, %c0_22] : memref<1x1x2x128xf32, #tpu.memory_space<vmem>>, vector<1x1x2x128xf32>
    %45 = vector.shape_cast %44 : vector<1x1x2x128xf32> to vector<2x128xf32>
    %46 = vector.shape_cast %43 : vector<2x128xf32> to vector<1x1x2x128xf32>
    tpu.vector_store %arg5[%c0_19, %c0_20, %c0_21, %c0_22], %46 {strides = array<i32>} : memref<1x1x2x128xf32, #tpu.memory_space<vmem>>, vector<1x1x2x128xf32>,
    return
  }
  func.func @transform_0(%arg0: i32, %arg1: i32) -> i32 {
    %c0_i32 = arith.constant 0 : i32
    %c0_i32_0 = arith.constant 0 : i32
    return %c0_i32 : i32
  }
  func.func @transform_1(%arg0: i32, %arg1: i32) -> (i32, i32, i32, i32) {
    %c0_i32 = arith.constant 0 : i32
    %c0_i32_0 = arith.constant 0 : i32
    %c0_i32_1 = arith.constant 0 : i32
    return %arg0, %c0_i32, %arg1, %c0_i32_0 : i32, i32, i32, i32
  }
  func.func @transform_2(%arg0: i32, %arg1: i32) -> (i32, i32, i32) {
    %c0_i32 = arith.constant 0 : i32
    %c0_i32_0 = arith.constant 0 : i32
    return %arg0, %arg1, %c0_i32 : i32, i32, i32
  }
  func.func @transform_3(%arg0: i32, %arg1: i32) -> (i32, i32, i32, i32) {
    %c0_i32 = arith.constant 0 : i32
    %c0_i32_0 = arith.constant 0 : i32
    %c0_i32_1 = arith.constant 0 : i32
    return %arg0, %arg1, %c0_i32, %c0_i32_0 : i32, i32, i32, i32
  }
}

module attributes {stable_mosaic.version = 11 : i64} {
  func.func @_gate_kernel(%arg0: i32, %arg1: memref<2xf32, #tpu.memory_space<smem>>, %arg2: memref<4x128xf32, #tpu.memory_space<vmem>>, %arg3: memref<4x128xf32, #tpu.memory_space<vmem>>) attributes {dimension_semantics = [#tpu.dimension_semantics<parallel>], iteration_bounds = array<i64: 1>, scalar_prefetch = 0 : i64, scratch_operands = 0 : i64, tpu.core_type = #tpu.core_type<tc>, window_params = [{transform_indices = @transform_0, window_bounds = array<i64: 2>}, {transform_indices = @transform_1, window_bounds = array<i64: 4, 128>}, {transform_indices = @transform_2, window_bounds = array<i64: 4, 128>}]} {
    %c0 = arith.constant 0 : index
    %c0_0 = arith.constant 0 : index
    %0 = vector.load %arg2[%c0, %c0_0] : memref<4x128xf32, #tpu.memory_space<vmem>>, vector<4x128xf32>
    %c0_1 = arith.constant 0 : index
    %1 = memref.load %arg1[%c0_1] : memref<2xf32, #tpu.memory_space<smem>>
    %2 = vector.broadcast %1 : f32 to vector<4x128xf32>
    %3 = arith.mulf %0, %2 : vector<4x128xf32>
    %c1 = arith.constant 1 : index
    %4 = memref.load %arg1[%c1] : memref<2xf32, #tpu.memory_space<smem>>
    %5 = vector.broadcast %4 : f32 to vector<4x128xf32>
    %6 = arith.addf %3, %5 : vector<4x128xf32>
    %cst = arith.constant 0.000000e+00 : f32
    %7 = vector.broadcast %cst : f32 to vector<4x128xf32>
    %8 = arith.subf %7, %6 : vector<4x128xf32>
    %9 = math.exp %8 : vector<4x128xf32>
    %cst_2 = arith.constant 1.000000e+00 : f32
    %10 = vector.broadcast %cst_2 : f32 to vector<4x128xf32>
    %11 = arith.addf %10, %9 : vector<4x128xf32>
    %12 = tpu.reciprocal %11 {approx = true} : vector<4x128xf32> -> vector<4x128xf32>
    %c0_3 = arith.constant 0 : index
    %c0_4 = arith.constant 0 : index
    %13 = vector.load %arg3[%c0_3, %c0_4] : memref<4x128xf32, #tpu.memory_space<vmem>>, vector<4x128xf32>
    tpu.vector_store %arg3[%c0_3, %c0_4], %12 {strides = array<i32>} : memref<4x128xf32, #tpu.memory_space<vmem>>, vector<4x128xf32>,
    return
  }
  func.func @transform_0(%arg0: i32) -> i32 {
    %c0_i32 = arith.constant 0 : i32
    %c0_i32_0 = arith.constant 0 : i32
    return %c0_i32 : i32
  }
  func.func @transform_1(%arg0: i32) -> (i32, i32) {
    %c0_i32 = arith.constant 0 : i32
    %c0_i32_0 = arith.constant 0 : i32
    return %arg0, %c0_i32 : i32, i32
  }
  func.func @transform_2(%arg0: i32) -> (i32, i32) {
    %c0_i32 = arith.constant 0 : i32
    %c0_i32_0 = arith.constant 0 : i32
    return %arg0, %c0_i32 : i32, i32
  }
}

</mosaic_0001>

<bundles_post_ra>
// kernel: sse_forward.3
= control target key start
LH: loop header
LB: loop body
LE: loop exit
PB: predicated region body
PF: predicated region fallthrough
CT: control target
= control target key end

     0   :  { %7 = vsyncpa [#allocation3], 0  ;;  %s62_s12 = smov [#allocation2]   ;;  %s87_s0 = inlined_call_operand.vmem [shape: f32[2], index: 0, kind: input, shape index: {}]   ;;  %s88_s1 = inlined_call_operand.vmem [shape: f32[4,128], index: 1, kind: input, shape index: {}]   ;;  %s89_s2 = inlined_call_operand.vmem [shape: f32[4,128], index: 2, kind: output, shape index: {}]  }
   0x1   :  { %s13_s11 = sshll.u32 %s87_s0, 4  ;;  %s14_s11 = int_to_ptr.vmem [resolvable:$true] %s13_s11 }
   0x2   :  { %16 = dma.vmem_to_smem %s14_s11, 16, %s62_s12, [#allocation3]  }
   0x3   :  { %60 = dma.done.wait [#allocation3], 16  }
   0x4   :  { %61 = vsyncadd [#allocation3], 4294967280 }
   0x5   :  { %23 = sfence }
   0x6   :  { %s25_s13 = sld [smem:[#allocation2]]  ;;  %v24_v0 = vld [vmem:[%s88_s1] sm:$0xf] }
   0x7   :  { %s42_s14 = sld [smem:[#allocation2 + $0x1]] }
   0xc   :  { %v26_v1 = vstv %s25_s13 }
   0xd   :  { %v27_v2 = vmul.f32 %v26_v1, %v24_v0  ;;  %v29_v3 = vstv %s42_s14 }
   0xf   :  { %v30_v4 = vadd.f32 %v29_v3, %v27_v2 }
  0x11   :  { %v31_v5 = vsub.f32 0.0, %v30_v4 }
  0x13   :  { %v32_v6 = vmul.f32 1.442695, %v31_v5 }
  0x15   :  { %44 = vpow2.f32 %v32_v6 }
  0x1b   :  { %v45_v7 = vpop.eup %44 }
  0x1c   :  { %v34_v8 = vadd.f32 1.0, %v45_v7 }
  0x1e   :  { %46 = vrcp.f32 %v34_v8 }
  0x24   :  { %v47_v9 = vpop.eup %46 }
  0x25   :  { %36 = vst [vmem:[%s89_s2] sm:$0xf] %v47_v9 }
  0x26   :  { %41 = vsyncpa [#allocation3], 1 }

// kernel: sse_forward.2
= control target key start
LH: loop header
LB: loop body
LE: loop exit
PB: predicated region body
PF: predicated region fallthrough
CT: control target
= control target key end

     0   :  { %9 = vsyncpa [#allocation3], 0  ;;  %s534_s12 = smov 0   ;;  %s536_s13 = smov 0   ;;  %s578_s0 = inlined_call_operand.vmem [shape: f32[4], index: 0, kind: input, shape index: {}]   ;;  %s579_s1 = inlined_call_operand.vmem [shape: f32[2,4,2,128], index: 1, kind: input, shape index: {}]   ;;  %s580_s2 = inlined_call_operand.vmem [shape: f32[2,2,128], index: 2, kind: output, shape index: {0}]   ;;  %s581_s3 = inlined_call_operand.vmem [shape: f32[2,1,2,128], index: 3, kind: output, shape index: {1}]  }
   0x1   :  { %s538_s14 = smov 0  }
   0x2 LB: > { %s415_s15 = sadd.s32 4294967295, %s511_s14   ;;  %s27_s16 = sadd.s32 1, %s507_s13  ;;  %s511_s14 = sphi %s538_s14, %s15_s14   ;;  %s507_s13 = sphi %s536_s13, %s583_s13   ;;  %s503_s12 = sphi %s534_s12, %s582_s12  }
   0x3   : > { %p29_p0 = scmp.ge.s32.totalorder %s27_s16, 2  ;;  %p417_p1 = scmp.ge.s32.totalorder %s511_s14, 1 }
   0x4   : > { %p137_p2 = scmp.lt.s32.totalorder %s511_s14, 3  ;;  %p443_p4 = scmp.eq.s32.totalorder %s415_s15, 0 }
   0x5   : > { %s585_s16 = smov (%p29_p0, %s27_s16), 0  ;;  %s149_s19 = sshll.u32 %s578_s0, 4  ;;  %s150_s19 = int_to_ptr.vmem [resolvable:$true] %s149_s19 }
   0x6   : > { %p138_p3 = pnand %p417_p1, %p137_p2  ;;  %s513_s20 = smov [#allocation2]  }
   0x8   : > { %p439_p5 = pneg %p138_p3  ;;  %173 = sbr.rel (%p138_p3) target bundleno = 57 (0x39), region = 28 }
   0xa   : > { %p440_p6 = pnand %p443_p4, %p439_p5 }
   0xc   : > { %442 = dma.vmem_to_smem (!%p440_p6), %s150_s19, 16, %s513_s20, [#allocation3]  }
   0xd   : > { %498 = dma.done.wait (%p443_p4), [#allocation3], 16  }
   0xe   : > { %500 = vsyncadd (%p443_p4), [#allocation3], 4294967280 }
   0xf   : > { %180 = sfence }
  0x10   : > { %p211_p7 = scmp.lt.s32.totalorder %s503_s12, 1  ;;  %s234_s21 = sld [smem:[#allocation2]]  ;;  %vm260_vm0 = vcmask 1041408   ;;  %vm278_vm1 = vcmask 1040384  }
  0x11   : > { %s427_s22 = sld [smem:[#allocation2 + $0x1]] }
  0x12   : > { %s587_s12 = smov (!%p211_p7, %s503_s12), 1  ;;  %s429_s23 = sld [smem:[#allocation2 + $0x2]] }
  0x13   : > { %s434_s24 = sshll.u32 %s587_s12, 3  ;;  %s431_s28 = sld [smem:[#allocation2 + $0x3]] }
  0x14   : > { %s218_s27 = scalar_lea.vmem %s579_s1, %s434_s24  ;;  %s424_s29 = sshll.u32 %s587_s12, 1 }
  0x15   : > { %v233_v0 = vld [vmem:[%s218_s27] sm:$0x3]  ;;  %v426_v2 = vld [vmem:[%s218_s27 + $0x2] sm:$0x3]  ;;  %v428_v5 = vld [vmem:[%s218_s27 + $0x4] sm:$0x3]  ;;  %s225_s5 = scalar_lea.vmem %s580_s2, %s424_s29  ;;  %s232_s8 = scalar_lea.vmem %s581_s3, %s424_s29 }
  0x16   : > { %v235_v1 = vstv %s234_s21  ;;  %v430_v10 = vld [vmem:[%s218_s27 + $0x6] sm:$0x3] }
  0x17   : > { %v236_v3 = vmul.f32 %v235_v1, %v233_v0  ;;  %v241_v4 = vstv %s427_s22 }
  0x18   : > { %v242_v6 = vmul.f32 %v426_v2, %v241_v4  ;;  %v248_v7 = vstv %s429_s23 }
  0x19   : > { %v249_v9 = vmul.f32 %v428_v5, %v248_v7  ;;  %v255_v12 = vstv %s431_s28 }
  0x1a   : > { %v243_v8 = vadd.f32 %v242_v6, %v236_v3  ;;  %v256_v13 = vmul.f32 %v430_v10, %v255_v12 }
  0x1c   : > { %v250_v11 = vadd.f32 %v249_v9, %v243_v8 }
  0x1e   : > { %v257_v14 = vadd.f32 %v256_v13, %v250_v11 }
  0x20   : > { %258 = vst [vmem:[%s225_s5] sm:$0x3] %v257_v14 }
  0x27   : > { %v259_v15 = vld [vmem:[%s225_s5] sm:$0x3] }
  0x28   : > { %v261_v16 = vsel %vm260_vm0, %v259_v15, 0.0  ;;  %v269_v17 = vmul.f32 %v259_v15, %v259_v15 }
  0x29   : > { %v262_v18 = vrot.slane %v261_v16, 4 }
  0x2a   : > { %v270_v19 = vsel %vm260_vm0, %v269_v17, 0.0 }
  0x2b   : > { %v263_v20 = vadd.f32 %v262_v18, %v261_v16  ;;  %v271_v21 = vrot.slane %v270_v19, 4 }
  0x2d   : > { %v264_v22 = vrot.slane %v263_v20, 2  ;;  %v272_v23 = vadd.f32 %v271_v21, %v270_v19 }
  0x2f   : > { %v265_v24 = vadd.f32 %v264_v22, %v263_v20  ;;  %v273_v25 = vrot.slane %v272_v23, 2 }
  0x31   : > { %v266_v26 = vrot.slane %v265_v24, 1  ;;  %v274_v27 = vadd.f32 %v273_v25, %v272_v23 }
  0x33   : > { %v275_v28 = vrot.slane %v274_v27, 1  ;;  %v267_v29 = vadd.f32 %v266_v26, %v265_v24 }
  0x35   : > { %v276_v30 = vadd.f32 %v275_v28, %v274_v27 }
  0x37   : > { %v279_v31 = vsel %vm278_vm1, %v267_v29, %v276_v30 }
  0x38   : > { %280 = vst [vmem:[%s232_s8] sm:$0x3] %v279_v31 }
  0x39 PF: > { %s15_s14 = sadd.s32 1, %s511_s14   ;;  %s582_s12 = smov %s507_s13 }
  0x3a   : > { %p12_p8 = scmp.ge.s32.totalorder %s15_s14, 4   ;;  %s583_s13 = smov %s585_s16 }
  0x3c   :  { %14 = sbr.rel (!%p12_p8) target bundleno = 2 (0x2), region = 78 }
  0x41   :  { %326 = vsyncpa [#allocation3], 1 }
  0x42   :  { %328 = vsyncpa [#allocation3 + $0x1], 1 }

</bundles_post_ra>
